<compile_context>
chip_gen: v6e
topology: v6e:2x2x1
jax: 0.10.0
libtpu: 0.0.40
codegen_flags: <defaults>
</compile_context>

<pallas_src>
import jax
import jax.numpy as jnp
from jax.experimental import pallas as pl
from jax.experimental.pallas import tpu as pltpu


def _round_up(n, m):
    return (n + m - 1) // m * m


def _silu_tanh(v):
    # v * sigmoid(v) == 0.5 * v * (1 + tanh(0.5 * v)); single EUP push per vreg.
    return 0.5 * v * (1.0 + jnp.tanh(0.5 * v))


def _fourier_kernel(x_ref, freq2_ref, phase_ref, w1t_ref, w2t_ref, o_ref):
    x = x_ref[...]                                        # (TB, 1) f32
    # Fused sin/cos: [sin(a), cos(a)] == sin([a, a] + [0, pi/2]); one EUP pass over 2H.
    emb = jnp.sin(x * freq2_ref[...] + phase_ref[...]) * x   # (TB, 2H) f32

    # dense1 (no bias): bf16 operands, f32 accumulation on the MXU.
    h = jnp.dot(emb.astype(jnp.bfloat16), w1t_ref[...],
                preferred_element_type=jnp.float32)       # (TB, 2P) f32
    h = _silu_tanh(h)

    # dense2 (no bias): output columns zero-padded to a lane-dense width at prep time.
    out = jnp.dot(h.astype(jnp.bfloat16), w2t_ref[...],
                  preferred_element_type=jnp.float32)     # (TB, P_pad) f32
    out = _silu_tanh(out)                                 # silu(0) == 0 -> padded lanes stay 0

    o_ref[...] = out.astype(o_ref.dtype)


def prepare_fourier_params(freq, w1, w2):
    """One-time parameter preparation (outside the per-call hot path).

    freq: (half_dim,)                          module's fixed frequency buffer
    w1:   (2*projection_dim, num_embed)        dense1.weight  (PyTorch layout)
    w2:   (projection_dim, 2*projection_dim)   dense2.weight  (PyTorch layout)
    """
    half_dim = freq.shape[0]
    num_embed = w1.shape[1]
    projection_dim = w2.shape[0]
    assert num_embed == 2 * half_dim, (num_embed, half_dim)
    assert w1.shape == (2 * projection_dim, num_embed), w1.shape
    assert w2.shape == (projection_dim, 2 * projection_dim), w2.shape

    freq = freq.astype(jnp.float32)
    # Fold the constant 1000.0 timestep scale and the sin/cos fusion into freq2/phase.
    freq2 = (jnp.concatenate([freq, freq]) * 1000.0).reshape(1, num_embed)
    phase = jnp.concatenate(
        [jnp.zeros((half_dim,), jnp.float32),
         jnp.full((half_dim,), jnp.pi / 2, jnp.float32)]).reshape(1, num_embed)

    # bf16 matmul operands (accumulation stays f32 inside the kernel).
    w1t = jnp.transpose(w1).astype(jnp.bfloat16)          # (2H, 2P)
    w2t = jnp.transpose(w2).astype(jnp.bfloat16)          # (2P, P)

    # Zero-pad dense2's output columns to a multiple of 128 -> unmasked lane-dense stores.
    p_pad = _round_up(projection_dim, 128)
    if p_pad != projection_dim:
        w2t = jnp.pad(w2t, ((0, 0), (0, p_pad - projection_dim)))
    return freq2, phase, w1t, w2t


def fourier_embedding(x, freq2, phase, w1t, w2t_padded, *, block_batch=2048):
    """Pallas forward of FourierEmbedding using params from prepare_fourier_params()."""
    if x.ndim == 1:
        x = x[:, None]
    x = x.astype(jnp.float32)

    B = x.shape[0]
    num_embed = freq2.shape[1]
    two_p = w1t.shape[1]
    P = two_p // 2
    p_pad = w2t_padded.shape[1]
    assert w1t.shape[0] == num_embed, (w1t.shape, num_embed)
    assert phase.shape == freq2.shape, (phase.shape, freq2.shape)
    assert w2t_padded.shape[0] == two_p, (w2t_padded.shape, two_p)

    # Batch tile: multiple of 8; capped so large B yields >= 2 grid steps (v7x megacore).
    b8 = _round_up(max(B, 1), 8)
    tb = min(_round_up(max(block_batch, 8), 8), _round_up(pl.cdiv(b8, 2), 8))
    tb = max(tb, 8)
    b_pad = _round_up(B, tb)
    if b_pad != B:
        x = jnp.pad(x, ((0, b_pad - B), (0, 0)))          # padded rows -> x=0 -> output 0
    grid = (b_pad // tb,)

    # Explicit VMEM budget: (tb,1) x windows are lane-padded to 128 in VMEM; out tiles are
    # (tb, p_pad); both double-buffered.  Matters on v5e's 16 MiB default scoped limit.
    bytes_x = tb * 128 * 4
    bytes_out = tb * p_pad * 4
    bytes_w = (num_embed * two_p + two_p * p_pad) * 2     # bf16 weights
    bytes_fp = 2 * num_embed * 4 * 2                      # freq2 + phase
    vmem_needed = 2 * (bytes_x + bytes_out) + 2 * (bytes_w + bytes_fp)
    vmem_limit = int(min(max(vmem_needed + (2 << 20), 16 << 20), 48 << 20))

    # Advisory cost: EUP-bound at scale (one sin + two tanh per row), never MXU-bound.
    flops = b_pad * 2 * (num_embed * two_p + two_p * p_pad)
    transcendentals = b_pad * (num_embed + two_p + p_pad)
    bytes_accessed = (4 * b_pad + 2 * 4 * num_embed
                      + 2 * (num_embed * two_p + two_p * p_pad)
                      + 4 * b_pad * p_pad)

    out = pl.pallas_call(
        _fourier_kernel,
        out_shape=jax.ShapeDtypeStruct((b_pad, p_pad), jnp.float32),
        grid=grid,
        in_specs=[
            pl.BlockSpec((tb, 1), lambda i: (i, 0)),            # x tile (pipelined)
            pl.BlockSpec((1, num_embed), lambda i: (0, 0)),     # freq2 (VMEM-resident)
            pl.BlockSpec((1, num_embed), lambda i: (0, 0)),     # phase (VMEM-resident)
            pl.BlockSpec((num_embed, two_p), lambda i: (0, 0)), # W1.T  (VMEM-resident)
            pl.BlockSpec((two_p, p_pad), lambda i: (0, 0)),     # W2.T  (VMEM-resident)
        ],
        out_specs=pl.BlockSpec((tb, p_pad), lambda i: (i, 0)),
        compiler_params=pltpu.CompilerParams(
            dimension_semantics=("parallel",),
            vmem_limit_bytes=vmem_limit),
        cost_estimate=pl.CostEstimate(
            flops=int(flops),
            transcendentals=int(transcendentals),
            bytes_accessed=int(bytes_accessed)),
    )(x, freq2, phase, w1t, w2t_padded)

    return out[:B, :P]


def _reference_torch_order(x, freq, w1, w2):
    """PyTorch op order, all f32 (the module's nominal math)."""
    if x.ndim == 1:
        x = x[:, None]
    angle = x * freq[None, :] * 1000.0
    emb = jnp.concatenate([jnp.sin(angle), jnp.cos(angle)], axis=-1) * x
    h = emb @ w1.T
    h = h * jax.nn.sigmoid(h)
    o = h @ w2.T
    return o * jax.nn.sigmoid(o)


def _reference_kernel_math(x, freq2, phase, w1t, w2t_padded, P):
    """Same math as the kernel (fused sin/cos, bf16 operands, tanh-SiLU) for a tight check."""
    if x.ndim == 1:
        x = x[:, None]
    x = x.astype(jnp.float32)
    emb = jnp.sin(x * freq2 + phase) * x
    h = jnp.dot(emb.astype(jnp.bfloat16), w1t, preferred_element_type=jnp.float32)
    h = _silu_tanh(h)
    o = jnp.dot(h.astype(jnp.bfloat16), w2t_padded, preferred_element_type=jnp.float32)
    o = _silu_tanh(o)
    return o[:, :P]


if __name__ == "__main__":
    projection_dim = 32
    num_embed = 64
    half_dim = num_embed // 2
    B = 8

    key = jax.random.PRNGKey(0)
    kx, k1, k2, kx2 = jax.random.split(key, 4)

    emb_scale = jnp.log(10000.0) / (half_dim - 1)
    freq = jnp.exp(-emb_scale * jnp.arange(half_dim, dtype=jnp.float32))

    bound1 = 1.0 / jnp.sqrt(num_embed)
    w1 = jax.random.uniform(k1, (2 * projection_dim, num_embed),
                            minval=-bound1, maxval=bound1, dtype=jnp.float32)
    bound2 = 1.0 / jnp.sqrt(2 * projection_dim)
    w2 = jax.random.uniform(k2, (projection_dim, 2 * projection_dim),
                            minval=-bound2, maxval=bound2, dtype=jnp.float32)

    # One-time parameter prep (no per-call transposes / scales / pads in the hot path).
    params = prepare_fourier_params(freq, w1, w2)

    # --- Test 1: small inference-sized batch of scalar "timesteps". ---
    x = jax.random.uniform(kx, (B,), dtype=jnp.float32)
    out = jax.block_until_ready(fourier_embedding(x, *params))
    assert out.shape == (B, projection_dim)

    # Tight check vs. a reference with exactly the kernel's math (fused sin/cos phase,
    # bf16 matmul operands, tanh-form SiLU).
    ref_tight = _reference_kernel_math(x, *params, projection_dim)
    assert jnp.allclose(out, ref_tight, atol=1e-4, rtol=1e-4), "mismatch vs kernel-math ref"
    # Check vs. the PyTorch op order in f32; tolerance covers the bf16 weight/operand
    # quantization and the folded 1000.0 scale reassociation.
    ref = _reference_torch_order(x, freq, w1, w2)
    assert jnp.allclose(out, ref, atol=1e-2, rtol=1e-2), "mismatch vs PyTorch-order ref"

    # --- Test 2: multi-tile grid + batch padding path (B not a multiple of the tile). ---
    B2 = 40
    x2 = jax.random.uniform(kx2, (B2,), dtype=jnp.float32)
    out2 = jax.block_until_ready(fourier_embedding(x2, *params, block_batch=16))
    assert out2.shape == (B2, projection_dim)
    ref2_tight = _reference_kernel_math(x2, *params, projection_dim)
    assert jnp.allclose(out2, ref2_tight, atol=1e-4, rtol=1e-4), "tiled mismatch (kernel math)"
    ref2 = _reference_torch_order(x2, freq, w1, w2)
    assert jnp.allclose(out2, ref2, atol=1e-2, rtol=1e-2), "tiled mismatch (torch order)"

    # --- Test 3: default (large) tile path with >= 2 grid steps. ---
    out3 = jax.block_until_ready(fourier_embedding(x2, *params))
    assert jnp.allclose(out3, ref2_tight, atol=1e-4, rtol=1e-4), "default-tile mismatch"

    print("KERNEL_OK")
</pallas_src>

<mosaic_0001>
module attributes {stable_mosaic.version = 11 : i64} {
  func.func @_fourier_kernel(%arg0: i32, %arg1: memref<8x1xf32, #tpu.memory_space<vmem>>, %arg2: memref<1x64xf32, #tpu.memory_space<vmem>>, %arg3: memref<1x64xf32, #tpu.memory_space<vmem>>, %arg4: memref<64x64xbf16, #tpu.memory_space<vmem>>, %arg5: memref<64x128xbf16, #tpu.memory_space<vmem>>, %arg6: memref<8x128xf32, #tpu.memory_space<vmem>>) attributes {dimension_semantics = [#tpu.dimension_semantics<parallel>], iteration_bounds = array<i64: 1>, scalar_prefetch = 0 : i64, scratch_operands = 0 : i64, tpu.core_type = #tpu.core_type<tc>, window_params = [{transform_indices = @transform_0, window_bounds = array<i64: 8, 1>}, {pipeline_mode = #tpu.pipeline_mode<synchronous>, transform_indices = @transform_1, window_bounds = array<i64: 1, 64>}, {pipeline_mode = #tpu.pipeline_mode<synchronous>, transform_indices = @transform_2, window_bounds = array<i64: 1, 64>}, {pipeline_mode = #tpu.pipeline_mode<synchronous>, transform_indices = @transform_3, window_bounds = array<i64: 64, 64>}, {pipeline_mode = #tpu.pipeline_mode<synchronous>, transform_indices = @transform_4, window_bounds = array<i64: 64, 128>}, {transform_indices = @transform_5, window_bounds = array<i64: 8, 128>}]} {
    %c0 = arith.constant 0 : index
    %c0_0 = arith.constant 0 : index
    %0 = vector.load %arg1[%c0, %c0_0] : memref<8x1xf32, #tpu.memory_space<vmem>>, vector<8x1xf32>
    %c0_1 = arith.constant 0 : index
    %c0_2 = arith.constant 0 : index
    %1 = vector.load %arg2[%c0_1, %c0_2] : memref<1x64xf32, #tpu.memory_space<vmem>>, vector<1x64xf32>
    %2 = vector.broadcast %0 : vector<8x1xf32> to vector<8x64xf32>
    %3 = vector.broadcast %1 : vector<1x64xf32> to vector<8x64xf32>
    %4 = arith.mulf %2, %3 : vector<8x64xf32>
    %c0_3 = arith.constant 0 : index
    %c0_4 = arith.constant 0 : index
    %5 = vector.load %arg3[%c0_3, %c0_4] : memref<1x64xf32, #tpu.memory_space<vmem>>, vector<1x64xf32>
    %6 = vector.broadcast %5 : vector<1x64xf32> to vector<8x64xf32>
    %7 = arith.addf %4, %6 : vector<8x64xf32>
    %8 = math.sin %7 : vector<8x64xf32>
    %9 = vector.broadcast %0 : vector<8x1xf32> to vector<8x64xf32>
    %10 = arith.mulf %8, %9 : vector<8x64xf32>
    %11 = arith.truncf %10 : vector<8x64xf32> to vector<8x64xbf16>
    %c0_5 = arith.constant 0 : index
    %c0_6 = arith.constant 0 : index
    %12 = vector.load %arg4[%c0_5, %c0_6] : memref<64x64xbf16, #tpu.memory_space<vmem>>, vector<64x64xbf16>
    %cst = arith.constant dense<0.000000e+00> : vector<8x64xf32>
    %13 = tpu.matmul %11, %12, %cst {dimension_numbers = #tpu.dot_dimension_numbers<[1], [0], [0], [1], [0, 0, 1, 1], [], []>} : vector<8x64xbf16>, vector<64x64xbf16>, vector<8x64xf32> -> vector<8x64xf32>
    %cst_7 = arith.constant 5.000000e-01 : f32
    %14 = vector.broadcast %cst_7 : f32 to vector<8x64xf32>
    %15 = arith.mulf %14, %13 : vector<8x64xf32>
    %cst_8 = arith.constant 5.000000e-01 : f32
    %16 = vector.broadcast %cst_8 : f32 to vector<8x64xf32>
    %17 = arith.mulf %16, %13 : vector<8x64xf32>
    %18 = math.tanh %17 : vector<8x64xf32>
    %cst_9 = arith.constant 1.000000e+00 : f32
    %19 = vector.broadcast %cst_9 : f32 to vector<8x64xf32>
    %20 = arith.addf %19, %18 : vector<8x64xf32>
    %21 = arith.mulf %15, %20 : vector<8x64xf32>
    %22 = arith.truncf %21 : vector<8x64xf32> to vector<8x64xbf16>
    %c0_10 = arith.constant 0 : index
    %c0_11 = arith.constant 0 : index
    %23 = vector.load %arg5[%c0_10, %c0_11] : memref<64x128xbf16, #tpu.memory_space<vmem>>, vector<64x128xbf16>
    %cst_12 = arith.constant dense<0.000000e+00> : vector<8x128xf32>
    %24 = tpu.matmul %22, %23, %cst_12 {dimension_numbers = #tpu.dot_dimension_numbers<[1], [0], [0], [1], [0, 0, 1, 1], [], []>} : vector<8x64xbf16>, vector<64x128xbf16>, vector<8x128xf32> -> vector<8x128xf32>
    %cst_13 = arith.constant 5.000000e-01 : f32
    %25 = vector.broadcast %cst_13 : f32 to vector<8x128xf32>
    %26 = arith.mulf %25, %24 : vector<8x128xf32>
    %cst_14 = arith.constant 5.000000e-01 : f32
    %27 = vector.broadcast %cst_14 : f32 to vector<8x128xf32>
    %28 = arith.mulf %27, %24 : vector<8x128xf32>
    %29 = math.tanh %28 : vector<8x128xf32>
    %cst_15 = arith.constant 1.000000e+00 : f32
    %30 = vector.broadcast %cst_15 : f32 to vector<8x128xf32>
    %31 = arith.addf %30, %29 : vector<8x128xf32>
    %32 = arith.mulf %26, %31 : vector<8x128xf32>
    %c0_16 = arith.constant 0 : index
    %c0_17 = arith.constant 0 : index
    %33 = vector.load %arg6[%c0_16, %c0_17] : memref<8x128xf32, #tpu.memory_space<vmem>>, vector<8x128xf32>
    tpu.vector_store %arg6[%c0_16, %c0_17], %32 {strides = array<i32>} : memref<8x128xf32, #tpu.memory_space<vmem>>, vector<8x128xf32>,
    return
  }
  func.func @transform_0(%arg0: i32) -> (i32, i32) {
    %c0_i32 = arith.constant 0 : i32
    %c0_i32_0 = arith.constant 0 : i32
    return %arg0, %c0_i32 : i32, i32
  }
  func.func @transform_1(%arg0: i32) -> (i32, i32) {
    %c0_i32 = arith.constant 0 : i32
    %c0_i32_0 = arith.constant 0 : i32
    %c0_i32_1 = arith.constant 0 : i32
    return %c0_i32, %c0_i32_0 : i32, i32
  }
  func.func @transform_2(%arg0: i32) -> (i32, i32) {
    %c0_i32 = arith.constant 0 : i32
    %c0_i32_0 = arith.constant 0 : i32
    %c0_i32_1 = arith.constant 0 : i32
    return %c0_i32, %c0_i32_0 : i32, i32
  }
  func.func @transform_3(%arg0: i32) -> (i32, i32) {
    %c0_i32 = arith.constant 0 : i32
    %c0_i32_0 = arith.constant 0 : i32
    %c0_i32_1 = arith.constant 0 : i32
    return %c0_i32, %c0_i32_0 : i32, i32
  }
  func.func @transform_4(%arg0: i32) -> (i32, i32) {
    %c0_i32 = arith.constant 0 : i32
    %c0_i32_0 = arith.constant 0 : i32
    %c0_i32_1 = arith.constant 0 : i32
    return %c0_i32, %c0_i32_0 : i32, i32
  }
  func.func @transform_5(%arg0: i32) -> (i32, i32) {
    %c0_i32 = arith.constant 0 : i32
    %c0_i32_0 = arith.constant 0 : i32
    return %arg0, %c0_i32 : i32, i32
  }
}

</mosaic_0001>

<bundles_post_ra>
// kernel: tpu_custom_call.1
= control target key start
LH: loop header
LB: loop body
LE: loop exit
PB: predicated region body
PF: predicated region fallthrough
CT: control target
= control target key end

     0   :  { %10 = vsyncpa [#allocation3], 0  ;;  %s605_s0 = inlined_call_operand.vmem [shape: f32[8,1], index: 0, kind: input, shape index: {}]   ;;  %s606_s1 = inlined_call_operand.vmem [shape: f32[1,64], index: 1, kind: input, shape index: {}]   ;;  %s607_s2 = inlined_call_operand.vmem [shape: f32[1,64], index: 2, kind: input, shape index: {}]   ;;  %s608_s3 = inlined_call_operand.hbm [shape: bf16[64,64], index: 3, kind: input, shape index: {}]   ;;  %s609_s4 = inlined_call_operand.hbm [shape: bf16[64,128], index: 4, kind: input, shape index: {}]   ;;  %s610_s5 = inlined_call_operand.hbm [shape: f32[8,128], index: 5, kind: output, shape index: {}]  }
   0x1   :  { %11 = vsyncpa [#allocation6], 0 }
   0x2   :  { %12 = vsyncpa [#allocation4], 0  ;;  %s506_s18 = smov [#allocation2]  }
   0x3   :  { %s24_s19 = sshll.u32 %s506_s18, 4  ;;  %s25_s19 = int_to_ptr.vmem [resolvable:$true] %s24_s19 }
   0x4   :  { %s448_s20 = scalar_lea.vmem %s25_s19, 512  ;;  %p453_p1 = scmp.lt.s32.totalorder %s25_s19, %s25_s19 }
   0x5   :  { %p449_p0 = scmp.ne.s32.totalorder %s25_s19, %s448_s20  ;;  %p454_p2 = scmp.lt.s32.totalorder %s448_s20, %s448_s20 }
   0x7   :  { %p455_p3 = por %p454_p2, %p453_p1 }
   0x9   :  { %p456_p4 = pnand %p455_p3, %p449_p0 }
   0xb   :  { %459 = shalt.err (!%p456_p4)
}
   0xc   :  { %s507_s21 = smov 64   ;;  %s508_s22 = smov 4  }
   0xd   :  { %30 = dma.hbm_to_vmem [thread:$0]  %s608_s3, 512, %s25_s19, [#allocation3], %s507_s21, %s507_s21, %s508_s22  }
   0xe   :  { %s509_s25 = smov [#allocation5]  }
   0xf   :  { %s36_s26 = sshll.u32 %s509_s25, 4  ;;  %s37_s26 = int_to_ptr.vmem [resolvable:$true] %s36_s26 }
  0x10   :  { %s468_s27 = scalar_lea.vmem %s37_s26, 512  ;;  %p473_p6 = scmp.lt.s32.totalorder %s37_s26, %s37_s26 }
  0x11   :  { %p469_p5 = scmp.ne.s32.totalorder %s37_s26, %s468_s27  ;;  %p474_p7 = scmp.lt.s32.totalorder %s468_s27, %s468_s27 }
  0x13   :  { %p475_p8 = por %p474_p7, %p473_p6 }
  0x15   :  { %p476_p9 = pnand %p475_p8, %p469_p5 }
  0x17   :  { %479 = shalt.err (!%p476_p9)
}
  0x18   :  { %42 = dma.hbm_to_vmem [thread:$0]  %s609_s4, 512, %s37_s26, [#allocation6], %s507_s21, %s507_s21, %s508_s22  }
  0x19   :  { %500 = dma.done.wait [#allocation3], 512  }
  0x1a   :  { %501 = vsyncadd [#allocation3], 4294966784 }
  0x1b   :  { %502 = dma.done.wait [#allocation6], 512  }
  0x1c   :  { %503 = vsyncadd [#allocation6], 4294966784  ;;  %v510_v0 = vmov 0   ;;  %v50_v1 = vld [vmem:[%s605_s0] sm:$0xff]  ;;  %v424_v2 = vld [vmem:[#allocation2 + $0x18] sm:$0xff]   ;;  %v511_v3 = vmov 0.0  }
  0x1d   :  { %423 = vset.pattern.permute.xlu0 %v510_v0  ;;  %381 = vmatprep.subr.bf16.mxu0 %v511_v3  ;;  %v425_v4 = vld [vmem:[#allocation2 + $0x10] sm:$0xff]   ;;  %v426_v5 = vld [vmem:[#allocation2 + $0x8] sm:$0xff]   ;;  %v427_v6 = vld [vmem:[#allocation2] sm:$0xff]   ;;  %vm512_vm0 = vmmov 0   ;;  %v513_v22 = vmov 683565275  }
  0x1e   :  { %54 = vperm.xlu0 %423, %v50_v1   ;;  %393 = vmatprep.subr.bf16.mxu1 %v511_v3  ;;  %v355_v7 = vld [vmem:[%s606_s1] ss:$0 sm:$0xff]  ;;  %v514_v24 = vmov 2475754826   ;;  %v515_v27 = vmov 2131351028  }
  0x1f   :  { %382 = vmatpush3.bf16.msra.mxu0 %v424_v2  ;;  %389 = vmatprep.mubr.msk.bf16.mxu0 %vm512_vm0, %v511_v3  ;;  %v356_v8 = vld [vmem:[%s607_s2] ss:$0 sm:$0xff]  ;;  %v516_v30 = vmov 2102212464   ;;  %v517_v33 = vmov 920167782  }
  0x20   :  { %383 = vmatprep.subr.bf16.mxu0 %v511_v3  ;;  %401 = vmatprep.mubr.msk.bf16.mxu1 %vm512_vm0, %v511_v3  ;;  %v518_v36 = vmov 1326507024   ;;  %vm210_vm14 = vcmask 523264   ;;  %s519_s1 = smov [#allocation7]  }
  0x21   :  { %s345_s2 = sshll.u32 %s519_s1, 4  ;;  %s346_s2 = int_to_ptr.vmem [resolvable:$true] %s345_s2 }
  0x22   :  { %s480_s8 = scalar_lea.vmem %s346_s2, 128  ;;  %p485_p11 = scmp.lt.s32.totalorder %s346_s2, %s346_s2 }
  0x23   :  { %384 = vmatpush3.bf16.msra.mxu0 %v425_v4  ;;  %p481_p10 = scmp.ne.s32.totalorder %s346_s2, %s480_s8  ;;  %p486_p12 = scmp.lt.s32.totalorder %s480_s8, %s480_s8 }
  0x24   :  { %385 = vmatprep.subr.bf16.mxu0 %v511_v3 }
  0x25   :  { %p487_p13 = por %p486_p12, %p485_p11 }
  0x27   :  { %386 = vmatpush3.bf16.msra.mxu0 %v426_v5  ;;  %p488_p0 = pnand %p487_p13, %p481_p10 }
  0x28   :  { %387 = vmatprep.subr.bf16.mxu0 %v511_v3 }
  0x2b   :  { %388 = vmatpush3.bf16.msra.mxu0 %v427_v6 }
  0x99   :  { %v572_v9 = vpop.permute.xlu0 %54 }
  0x9a   :  { %v63_v10 = vmul.f32 %v355_v7, %v572_v9 }
  0x9c   :  { %v575_v11 = vadd.f32 %v356_v8, %v63_v10 }
  0x9e   :  { %v75_v12 = vand.u32 2139095040, %v575_v11  ;;  %v72_v16 = vand.u32 2147483647, %v575_v11  ;;  %vm74_vm8 = vcmp.lt.s32.totalorder %v575_v11, 0  ;;  %vm164_vm13 = vweird.f32 %v575_v11 }
  0xa0   :  { %v76_v13 = vshrl.u32 %v75_v12, 23  ;;  %v79_v19 = vand.u32 8388607, %v72_v16  ;;  %vm73_vm9 = vcmp.le.f32.partialorder %v72_v16, 0.7853982 }
  0xa2   :  { %v357_v14 = vadd.s32 4294967169, %v76_v13  ;;  %v80_v38 = vor.u32 8388608, %v79_v19 }
  0xa4   :  { %v82_v15 = vadd.s32 1, %v357_v14  ;;  %v120_v52 = vshll.u32 %v80_v38, 8 }
  0xa6   :  { %vm83_vm1 = vcmp.gt.s32.totalorder %v82_v15, 0 }
  0xa7   :  { %v84_v17 = vsel %vm83_vm1, %v82_v15, 0 }
  0xa8   :  { %v86_v18 = vand.u32 31, %v84_v17  ;;  %v85_v21 = vshrl.u32 %v84_v17, 5 }
  0xaa   :  { %v87_v20 = vsub.s32 32, %v86_v18  ;;  %v89_v23 = vshll.u32 %v513_v22, %v86_v18  ;;  %v92_v25 = vshll.u32 %v514_v24, %v86_v18  ;;  %v95_v29 = vshll.u32 %v515_v27, %v86_v18 }
  0xab   :  { %v98_v32 = vshll.u32 %v516_v30, %v86_v18  ;;  %v101_v35 = vshll.u32 %v517_v33, %v86_v18  ;;  %vm104_vm2 = vcmp.lt.s32.totalorder %v85_v21, 1  ;;  %vm107_vm3 = vcmp.lt.s32.totalorder %v85_v21, 4 }
  0xac   :  { %v90_v26 = vshrl.u32 %v514_v24, %v87_v20  ;;  %v93_v28 = vshrl.u32 %v515_v27, %v87_v20  ;;  %v96_v31 = vshrl.u32 %v516_v30, %v87_v20  ;;  %v99_v34 = vshrl.u32 %v517_v33, %v87_v20 }
  0xad   :  { %v102_v37 = vshrl.u32 %v518_v36, %v87_v20  ;;  %v88_v47 = vshrl.u32 %v513_v22, %v87_v20  ;;  %vm106_vm4 = vcmp.lt.s32.totalorder %v85_v21, 3  ;;  %vm105_vm5 = vcmp.lt.s32.totalorder %v85_v21, 2 }
  0xae   :  { %v91_v39 = vor.u32 %v90_v26, %v89_v23  ;;  %v94_v40 = vor.u32 %v93_v28, %v92_v25  ;;  %v97_v41 = vor.u32 %v96_v31, %v95_v29  ;;  %v100_v42 = vor.u32 %v99_v34, %v98_v32 }
  0xaf   :  { %v103_v43 = vor.u32 %v102_v37, %v101_v35 }
  0xb0   :  { %v109_v44 = vsel %vm107_vm3, %v97_v41, 2102212464  ;;  %v112_v45 = vsel %vm104_vm2, %v91_v39, %v94_v40  ;;  %v116_v46 = vsel %vm104_vm2, %v94_v40, %v97_v41  ;;  %v113_v48 = vsel %vm107_vm3, %v100_v42, 920167782 }
  0xb1   :  { %v117_v49 = vsel %vm107_vm3, %v103_v43, 1326507024  ;;  %v114_v50 = vsel %vm106_vm4, %v97_v41, %v113_v48  ;;  %v108_v53 = vsel %vm104_vm2, %v88_v47, %v91_v39  ;;  %v110_v54 = vsel %vm106_vm4, %v94_v40, %v109_v44  ;;  %v428_v44 = vld [vmem:[#allocation5 + $0x18] sm:$0xff]  }
  0xb2   :  { %v118_v51 = vsel %vm106_vm4, %v100_v42, %v117_v49  ;;  %v115_v55 = vsel %vm105_vm5, %v112_v45, %v114_v50  ;;  %v111_v61 = vsel %vm105_vm5, %v108_v53, %v110_v54  ;;  %394 = vmatpush3.bf16.msra.mxu1 %v428_v44  ;;  %v429_v45 = vld [vmem:[#allocation5 + $0x10] sm:$0xff]  }
  0xb3   :  { %v119_v56 = vsel %vm105_vm5, %v116_v46, %v118_v51  ;;  %v584_v59 = vmul.u32.u64.low %v120_v52, %v115_v55  ;;  %v585_v60 = vmul.u32.u64.high %v120_v52, %v115_v55, %v584_v59  ;;  %v127_v63 = vmul.u32 %v120_v52, %v111_v61  ;;  %395 = vmatprep.subr.bf16.mxu1 %v511_v3  ;;  %v430_v46 = vld [vmem:[#allocation5 + $0x8] sm:$0xff]  }
  0xb4   :  { %v581_v57 = vmul.u32.u64.low %v120_v52, %v119_v56  ;;  %v582_v58 = vmul.u32.u64.high %v120_v52, %v119_v56, %v581_v57 }
  0xb5   :  { %v130_v62 = vadd.s32 1, %v585_v60 }
  0xb6   :  { %vm129_vm6 = vc.u32 %v582_v58, %v584_v59  ;;  %v128_v14 = vadd.s32 %v584_v59, %v582_v58  ;;  %396 = vmatpush3.bf16.msra.mxu1 %v429_v45 }
  0xb7   :  { %v131_v0 = vsel %vm129_vm6, %v130_v62, %v585_v60  ;;  %397 = vmatprep.subr.bf16.mxu1 %v511_v3 }
  0xb8   :  { %v132_v1 = vadd.s32 %v131_v0, %v127_v63 }
  0xba   :  { %v133_v2 = vadd.s32 536870912, %v132_v1  ;;  %398 = vmatpush3.bf16.msra.mxu1 %v430_v46 }
  0xbb   :  { %399 = vmatprep.subr.bf16.mxu1 %v511_v3 }
  0xbc   :  { %v134_v4 = vshrl.u32 %v133_v2, 30 }
  0xbe   :  { %v135_v5 = vshll.u32 %v134_v4, 30  ;;  %v158_v28 = vsub.s32 4, %v134_v4 }
  0xc0   :  { %v136_v6 = vsub.s32 %v132_v1, %v135_v5  ;;  %v159_v31 = vsel %vm74_vm8, %v158_v28, %v134_v4 }
  0xc1   :  { %v161_v32 = vsel %vm73_vm9, 0, %v159_v31 }
  0xc2   :  { %v138_v7 = vsub.s32 0, %v136_v6  ;;  %v165_v33 = vadd.s32 3, %v161_v32 }
  0xc4   :  { %v358_v8 = vmin.u32 %v138_v7, %v136_v6  ;;  %v166_v34 = vand.u32 3, %v165_v33 }
  0xc6   :  { %v140_v10 = vclz %v358_v8  ;;  %vm171_vm10 = vcmp.eq.s32.totalorder %v166_v34, 2  ;;  %vm168_vm11 = vcmp.eq.s32.totalorder %v166_v34, 0  ;;  %vm167_vm12 = vcmp.lt.s32.totalorder %v166_v34, 2 }
  0xc8   :  { %v359_v12 = vadd.s32 4294967294, %v140_v10 }
  0xca   :  { %vm360_vm7 = vcmp.lt.s32.totalorder %v359_v12, 0 }
  0xcb   :  { %v143_v13 = vsel %vm360_vm7, 0, %v359_v12 }
  0xcc   :  { %v144_v15 = vsub.s32 32, %v143_v13  ;;  %v148_v17 = vsub.s32 4294967266, %v143_v13  ;;  %v145_v18 = vshll.u32 %v136_v6, %v143_v13 }
  0xce   :  { %v146_v19 = vshrl.u32 %v128_v14, %v144_v15  ;;  %v149_v20 = vadd.s32 127, %v148_v17 }
  0xd0   :  { %v147_v21 = vor.u32 %v146_v19, %v145_v18  ;;  %v150_v22 = vshll.u32 %v149_v20, 23 }
  0xd2   :  { %v151_v23 = vor.u32 4788187, %v150_v22  ;;  %v154_v25 = vcvt.s32.f32 %v147_v21 }
  0xd4   :  { %v152_v24 = vand.u32 2147483647, %v151_v23 }
  0xd6   :  { %v155_v26 = vmul.f32 %v154_v25, %v152_v24 }
  0xd8   :  { %v156_v27 = vxor.u32 2147483648, %v155_v26 }
  0xda   :  { %v157_v29 = vsel %vm74_vm8, %v156_v27, %v155_v26 }
  0xdb   :  { %v160_v30 = vsel %vm73_vm9, %v575_v11, %v157_v29  ;;  %v431_v11 = vld [vmem:[#allocation5] sm:$0xff]  }
  0xdc   :  { %432 = vcosq.f32 %v160_v30  ;;  %400 = vmatpush3.bf16.msra.mxu1 %v431_v11 }
  0xdd   :  { %434 = vsinq.f32 %v160_v30 }
  0xe9   :  { %v433_v35 = vpop.eup %432 }
  0xea   :  { %v435_v36 = vpop.eup %434  ;;  %v172_v37 = vxor.u32 2147483648, %v433_v35 }
  0xeb   :  { %v169_v38 = vxor.u32 2147483648, %v435_v36 }
  0xec   :  { %v173_v39 = vsel %vm171_vm10, %v172_v37, %v435_v36 }
  0xed   :  { %v170_v40 = vsel %vm168_vm11, %v433_v35, %v169_v38 }
  0xee   :  { %v174_v16 = vsel %vm167_vm12, %v170_v40, %v173_v39 }
  0xef   :  { %v175_v41 = vsel %vm164_vm13, nan, %v174_v16 }
  0xf0   :  { %v176_v42 = vmul.f32 %v175_v41, %v572_v9 }
  0xf2   :  { %v177_v43 = vpack.c.bf16 %v176_v42, %v176_v42 }
  0xf4   :  { %390 = vmatmul.mubr.msk.bf16.vlgmr.msra.gmra.mxu0 %vm210_vm14, %v177_v43 }
 0x1b4   :  { %v248_v47 = vpop.f32.mrf.mxu0 }
 0x1b5   :  { %v254_v9 = vmul.f32 0.5, %v248_v47 }
 0x1b6   :  { %v391_v48 = vpop.f32.mrf.mxu0 }
 0x1b7   :  { %436 = vtanh.f32 %v254_v9 }
 0x1b8   :  { %v251_v49 = vpop.f32.mrf.mxu0 }
 0x1ba   :  { %v392_v50 = vpop.f32.mrf.mxu0 }
 0x1c4   :  { %v437_v51 = vpop.eup %436 }
 0x1c5   :  { %v256_v52 = vadd.f32 1.0, %v437_v51 }
 0x1c7   :  { %v257_v53 = vmul.f32 %v256_v52, %v254_v9 }
 0x1c9   :  { %v258_v54 = vpack.c.bf16 %v257_v53, %v257_v53 }
 0x1cb   :  { %402 = vmatmul.mubr.msk.bf16.vlgmr.msra.gmra.mxu1 %vm210_vm14, %v258_v54 }
 0x28b   :  { %v328_v55 = vpop.f32.mrf.mxu1 }
 0x28c   :  { %v334_v56 = vmul.f32 0.5, %v328_v55 }
 0x28d   :  { %v403_v57 = vpop.f32.mrf.mxu1 }
 0x28e   :  { %438 = vtanh.f32 %v334_v56 }
 0x28f   :  { %v331_v58 = vpop.f32.mrf.mxu1 }
 0x291   :  { %v404_v3 = vpop.f32.mrf.mxu1 }
 0x29b   :  { %v439_v59 = vpop.eup %438 }
 0x29c   :  { %v336_v60 = vadd.f32 1.0, %v439_v59 }
 0x29e   :  { %v337_v61 = vmul.f32 %v336_v60, %v334_v56 }
 0x2a0   :  { %338 = vst [vmem:[#allocation7] sm:$0xff] %v337_v61 }
 0x2a1   :  { %491 = shalt.err (!%p488_p0)
}
 0x2a2   :  { %348 = dma.vmem_to_hbm [thread:$0]  %s346_s2, 128, %s610_s5, [#allocation4]  }
 0x2a3   :  { %504 = dma.done.wait [#allocation4], 128  }
 0x2a4   :  { %505 = vsyncadd [#allocation4], 4294967168 }
 0x2a5   :  { %352 = vsyncpa [#allocation3], 1 }
 0x2a6   :  { %353 = vsyncpa [#allocation6], 1 }
 0x2a7   :  { %354 = vsyncpa [#allocation4], 1 }

</bundles_post_ra>
